<compile_context>
chip_gen: v7x
topology: tpu7x:2x2x1
jax: 0.10.0
libtpu: 0.0.40
codegen_flags: <defaults>
</compile_context>

<pallas_src>
import math

import jax
import jax.numpy as jnp
from jax import lax
from jax.experimental import pallas as pl
from jax.experimental.pallas import tpu as pltpu

PI = math.pi
SSP_SHIFT = math.log(2.0)


def _round_up(v, m):
    return (v + m - 1) // m * m


def _ssp(v):
    # shifted softplus: log(1 + exp(v)) - log(2), numerically stable
    return jnp.logaddexp(v, 0.0) - SSP_SHIFT


def make_cfconv_edge_kernel(cutoff: float, smooth: bool, compute_dtype):
    cdt = compute_dtype

    def kernel(src_ref, tgt_ref, el_ref, ea_ref,   # (TE,1)i32 (TE,1)i32 (TE,1)f32 (TE,G_pad)cdt
               x1_ref,                             # (N_pad, F_pad) cdt, resident
               w1_ref, b1_ref, w2_ref, b2_ref,     # filter MLP (padded)
               agg_ref):                           # (N_pad, F_pad) f32 output block (accumulator)
        t = pl.program_id(1)

        # zero the per-chunk accumulator on the chunk's first edge tile
        @pl.when(t == 0)
        def _init():
            agg_ref[...] = jnp.zeros_like(agg_ref)

        # ---- filter-generating MLP on this edge tile ----------------------
        h = jnp.dot(ea_ref[...], w1_ref[...],
                    preferred_element_type=jnp.float32) + b1_ref[...]
        h = _ssp(h)
        W = jnp.dot(h.astype(cdt), w2_ref[...],
                    preferred_element_type=jnp.float32) + b2_ref[...]      # (TE, F_pad) f32

        # ---- cutoff envelope (single fused where; zeroes padded edges too) -
        el = el_ref[...]                                                   # (TE, 1) f32
        if smooth:
            C = 0.5 * (jnp.cos(el * (PI / cutoff)) + 1.0)
            C = jnp.where((el <= cutoff) & (el >= 0.0), C, 0.0)
        else:
            C = jnp.where(el <= cutoff, 1.0, 0.0)
        W = W * C                                                          # (TE, F_pad)

        # ---- gather x_j = x1[src] via one-hot on the MXU -------------------
        # (OOB/padded src rows produce an all-zero one-hot row -> zero x_j.)
        n_pad = x1_ref.shape[0]
        te = src_ref.shape[0]
        ids = lax.broadcasted_iota(jnp.int32, (te, n_pad), 1)
        Gs = (ids == src_ref[...]).astype(cdt)                             # (TE, N_pad)
        x_j = jnp.dot(Gs, x1_ref[...],
                      preferred_element_type=jnp.float32)                  # (TE, F_pad) f32

        msg = (x_j * W).astype(cdt)                                        # (TE, F_pad)

        # ---- scatter-add over targets via one-hot on the MXU ---------------
        Gt = (ids == tgt_ref[...]).astype(cdt)                             # (TE, N_pad)
        agg_ref[...] += lax.dot_general(
            Gt, msg, dimension_numbers=(((0,), (0,)), ((), ())),
            preferred_element_type=jnp.float32)                            # (N_pad, F_pad)

    return kernel


def prepare_filter_params(params, compute_dtype=jnp.bfloat16):
    """Pad/cast the filter-MLP weights once; reusable across calls."""
    G, F_ = params["mlp_w1"].shape
    G_pad, F_pad = _round_up(G, 128), _round_up(F_, 128)
    f32 = jnp.float32

    def pad2(w, r, c, dt):
        w = w.astype(f32)
        return jnp.pad(w, ((0, r - w.shape[0]), (0, c - w.shape[1]))).astype(dt)

    return {
        "G": G, "F": F_, "G_pad": G_pad, "F_pad": F_pad,
        "mlp_w1": pad2(params["mlp_w1"], G_pad, F_pad, compute_dtype),
        "mlp_b1": pad2(params["mlp_b1"], 1, F_pad, f32),
        "mlp_w2": pad2(params["mlp_w2"], F_pad, F_pad, compute_dtype),
        "mlp_b2": pad2(params["mlp_b2"], 1, F_pad, f32),
    }


def interaction_block(x, edge_index, edge_length, edge_attr, params,
                      cutoff: float, smooth: bool, *,
                      compute_dtype=jnp.bfloat16, tile_e=None,
                      num_chunks=2, prepared=None):
    """x: (N,H) f32, edge_index: (2,E) int32, edge_length: (E,) f32,
    edge_attr: (E,G) f32."""
    N, H = x.shape
    E, G = edge_attr.shape
    F_ = params["mlp_w1"].shape[1]
    f32, i32 = jnp.float32, jnp.int32
    cdt = compute_dtype

    if prepared is None:
        prepared = prepare_filter_params(params, compute_dtype=cdt)
    G_pad, F_pad = prepared["G_pad"], prepared["F_pad"]
    # 128-aligned node axis: lane-dense one-hots, aligned agg rows.
    N_pad = _round_up(N, 128)

    ebytes = jnp.dtype(cdt).itemsize

    # ---- edge tile size: as big as a ~8 MiB VMEM slice allows --------------
    if tile_e is None:
        per_edge = (2 * (G_pad * ebytes + 12)        # double-buffered edge streams
                    + 2 * N_pad * ebytes             # Gs, Gt one-hot temporaries
                    + 4 * F_pad * 4)                 # h, W, x_j, msg temporaries
        cap = max(128, min(2048, (8 * 1024 * 1024 // per_edge) // 128 * 128))
        tile_e = int(min(cap, _round_up(-(-E // num_chunks), 8)))
    tile_e = max(8, _round_up(tile_e, 8))

    tiles_total = -(-E // tile_e)
    tiles_per_chunk = max(1, -(-tiles_total // num_chunks))
    E_pad = num_chunks * tiles_per_chunk * tile_e

    # ---- head (lin1, no bias) hoisted to XLA, then pad + cast --------------
    x1 = x.astype(f32) @ params["lin1_w"].astype(f32)                       # (N, F)
    x1p = jnp.pad(x1, ((0, N_pad - N), (0, F_pad - F_))).astype(cdt)

    # ---- edge arrays: jnp.pad; padded edges get length > cutoff (=> C = 0) -
    src = jnp.pad(edge_index[0].astype(i32).reshape(E, 1), ((0, E_pad - E), (0, 0)))
    tgt = jnp.pad(edge_index[1].astype(i32).reshape(E, 1), ((0, E_pad - E), (0, 0)))
    el = jnp.pad(edge_length.astype(f32).reshape(E, 1), ((0, E_pad - E), (0, 0)),
                 constant_values=float(cutoff) + 1.0)
    ea = jnp.pad(edge_attr.astype(f32),
                 ((0, E_pad - E), (0, G_pad - G))).astype(cdt)

    # ---- BlockSpecs ---------------------------------------------------------
    def edge_spec(cols):
        return pl.BlockSpec((tile_e, cols),
                            lambda c, t: (c * tiles_per_chunk + t, 0))

    def const_spec(shape):
        return pl.BlockSpec(shape, lambda c, t: (0, 0))

    kernel = make_cfconv_edge_kernel(float(cutoff), bool(smooth), cdt)

    # ---- VMEM budget from actual buffers (capped at v7x's 64 MiB) ----------
    vmem_est = (2 * tile_e * (G_pad * ebytes + 12)            # edge streams (x2 buffers)
                + 2 * N_pad * F_pad * ebytes                  # x1 (assume double-buffered)
                + 2 * (G_pad * F_pad + F_pad * F_pad) * ebytes  # w1, w2
                + 4 * 2 * F_pad * 4                           # b1, b2
                + N_pad * F_pad * 4                           # resident output block
                + 2 * tile_e * N_pad * ebytes                 # one-hot temporaries
                + 4 * tile_e * F_pad * 4)                     # h, W, x_j, msg
    vmem_limit = int(min(64 * 1024 * 1024,
                         max(16 * 1024 * 1024, int(vmem_est * 1.5))))

    flops = 2 * E_pad * F_pad * (G_pad + F_pad + 2 * N_pad)
    transc = E_pad * (F_pad + 1)
    bytes_acc = (E_pad * (G_pad * ebytes + 12)
                 + N_pad * F_pad * ebytes
                 + (G_pad * F_pad + F_pad * F_pad) * ebytes + 4 * F_pad * 4
                 + num_chunks * N_pad * F_pad * 4)

    partial = pl.pallas_call(
        kernel,
        out_shape=jax.ShapeDtypeStruct((num_chunks * N_pad, F_pad), f32),
        grid=(num_chunks, tiles_per_chunk),
        in_specs=[
            edge_spec(1),                    # src   (TE, 1) int32
            edge_spec(1),                    # tgt   (TE, 1) int32
            edge_spec(1),                    # edge_length (TE, 1) f32
            edge_spec(G_pad),                # edge_attr (TE, G_pad) cdt
            const_spec((N_pad, F_pad)),      # x1 (resident)
            const_spec((G_pad, F_pad)),      # mlp_w1
            const_spec((1, F_pad)),          # mlp_b1
            const_spec((F_pad, F_pad)),      # mlp_w2
            const_spec((1, F_pad)),          # mlp_b2
        ],
        out_specs=pl.BlockSpec((N_pad, F_pad), lambda c, t: (c, 0)),
        compiler_params=pltpu.CompilerParams(
            dimension_semantics=("parallel", "arbitrary"),
            vmem_limit_bytes=vmem_limit),
        cost_estimate=pl.CostEstimate(flops=int(flops),
                                      transcendentals=int(transc),
                                      bytes_accessed=int(bytes_acc)),
    )(src, tgt, el, ea, x1p,
      prepared["mlp_w1"], prepared["mlp_b1"],
      prepared["mlp_w2"], prepared["mlp_b2"])

    # ---- combine per-chunk partial aggregates + tail (tiny O(N) XLA work) --
    agg = partial.reshape(num_chunks, N_pad, F_pad).sum(axis=0)[:N, :F_]
    x2 = agg @ params["lin2_w"].astype(f32) + params["lin2_b"].astype(f32)
    x3 = _ssp(x2)
    return x3 @ params["lin_w"].astype(f32) + params["lin_b"].astype(f32)


def _reference(x, edge_index, edge_length, edge_attr, params, cutoff, smooth):
    # pure-JAX reference for correctness check
    src, tgt = edge_index[0], edge_index[1]
    h = _ssp(edge_attr @ params["mlp_w1"] + params["mlp_b1"])
    W = h @ params["mlp_w2"] + params["mlp_b2"]
    el = edge_length.reshape(-1, 1)
    if smooth:
        C = 0.5 * (jnp.cos(el * PI / cutoff) + 1.0)
        C = C * (el <= cutoff) * (el >= 0.0)
    else:
        C = (el <= cutoff).astype(jnp.float32)
    W = W * C
    x1 = x @ params["lin1_w"]
    msg = x1[src] * W
    agg = jax.ops.segment_sum(msg, tgt, num_segments=x.shape[0])
    x2 = agg @ params["lin2_w"] + params["lin2_b"]
    x3 = _ssp(x2)
    return x3 @ params["lin_w"] + params["lin_b"]


def init_params(key, hidden_channels, num_gaussians, num_filters):
    ks = jax.random.split(key, 6)

    def xavier(k, fan_in, fan_out):
        bound = math.sqrt(6.0 / (fan_in + fan_out))
        # stored as (in, out) so forward computes x @ W
        return jax.random.uniform(k, (fan_in, fan_out), jnp.float32,
                                  -bound, bound)

    return {
        # filter MLP: Linear(G, F) -> SSP -> Linear(F, F)
        "mlp_w1": xavier(ks[0], num_gaussians, num_filters),
        "mlp_b1": jnp.zeros((1, num_filters), jnp.float32),
        "mlp_w2": xavier(ks[1], num_filters, num_filters),
        "mlp_b2": jnp.zeros((1, num_filters), jnp.float32),
        # CFConv lin1 (no bias), lin2 (bias=0 per reset_parameters)
        "lin1_w": xavier(ks[2], hidden_channels, num_filters),
        "lin2_w": xavier(ks[3], num_filters, hidden_channels),
        "lin2_b": jnp.zeros((1, hidden_channels), jnp.float32),
        # outer lin
        "lin_w": xavier(ks[4], hidden_channels, hidden_channels),
        "lin_b": jax.random.uniform(ks[5], (1, hidden_channels), jnp.float32,
                                    -0.01, 0.01),
    }


if __name__ == "__main__":
    hidden_channels = 32
    num_gaussians = 16
    num_filters = 32
    cutoff = 10.0
    smooth = True

    N = 8    # nodes
    E = 16   # edges

    key = jax.random.PRNGKey(0)
    k_x, k_ei, k_el, k_ea, k_p = jax.random.split(key, 5)

    x = jax.random.normal(k_x, (N, hidden_channels), jnp.float32)
    edge_index = jax.random.randint(k_ei, (2, E), 0, N, jnp.int32)
    edge_length = jax.random.uniform(k_el, (E,), jnp.float32, 0.0, 12.0)
    edge_attr = jax.random.normal(k_ea, (E, num_gaussians), jnp.float32)

    params = init_params(k_p, hidden_channels, num_gaussians, num_filters)
    ref = _reference(x, edge_index, edge_length, edge_attr, params, cutoff, smooth)

    # Exactness check: f32 compute path matches the f32 reference tightly.
    out_f32 = interaction_block(x, edge_index, edge_length, edge_attr, params,
                                cutoff, smooth, compute_dtype=jnp.float32)
    out_f32 = jax.block_until_ready(out_f32)
    assert out_f32.shape == (N, hidden_channels)
    assert jnp.allclose(out_f32, ref, atol=1e-4, rtol=1e-4), "f32 mismatch vs reference"

    # Fast path: bf16 MXU operands (f32 accumulation). Looser tolerance vs the
    # all-f32 reference because edge_attr / filter weights / x1 / msg are bf16.
    prepped = prepare_filter_params(params, compute_dtype=jnp.bfloat16)
    out_bf16 = interaction_block(x, edge_index, edge_length, edge_attr, params,
                                 cutoff, smooth, compute_dtype=jnp.bfloat16,
                                 prepared=prepped)
    out_bf16 = jax.block_until_ready(out_bf16)
    assert out_bf16.shape == (N, hidden_channels)
    assert jnp.allclose(out_bf16, ref, atol=5e-2, rtol=5e-2), "bf16 mismatch vs reference"

    print("KERNEL_OK")
</pallas_src>

<mosaic_0001>
module attributes {stable_mosaic.version = 11 : i64} {
  func.func @kernel(%arg0: i32, %arg1: i32, %arg2: memref<8x1xi32, #tpu.memory_space<vmem>>, %arg3: memref<8x1xi32, #tpu.memory_space<vmem>>, %arg4: memref<8x1xf32, #tpu.memory_space<vmem>>, %arg5: memref<8x128xf32, #tpu.memory_space<vmem>>, %arg6: memref<128x128xf32, #tpu.memory_space<vmem>>, %arg7: memref<128x128xf32, #tpu.memory_space<vmem>>, %arg8: memref<1x128xf32, #tpu.memory_space<vmem>>, %arg9: memref<128x128xf32, #tpu.memory_space<vmem>>, %arg10: memref<1x128xf32, #tpu.memory_space<vmem>>, %arg11: memref<128x128xf32, #tpu.memory_space<vmem>>) attributes {dimension_semantics = [#tpu.dimension_semantics<parallel>, #tpu.dimension_semantics<arbitrary>], iteration_bounds = array<i64: 2, 1>, scalar_prefetch = 0 : i64, scratch_operands = 0 : i64, tpu.core_type = #tpu.core_type<tc>, window_params = [{transform_indices = @transform_0, window_bounds = array<i64: 8, 1>}, {transform_indices = @transform_1, window_bounds = array<i64: 8, 1>}, {transform_indices = @transform_2, window_bounds = array<i64: 8, 1>}, {transform_indices = @transform_3, window_bounds = array<i64: 8, 128>}, {pipeline_mode = #tpu.pipeline_mode<synchronous>, transform_indices = @transform_4, window_bounds = array<i64: 128, 128>}, {pipeline_mode = #tpu.pipeline_mode<synchronous>, transform_indices = @transform_5, window_bounds = array<i64: 128, 128>}, {pipeline_mode = #tpu.pipeline_mode<synchronous>, transform_indices = @transform_6, window_bounds = array<i64: 1, 128>}, {pipeline_mode = #tpu.pipeline_mode<synchronous>, transform_indices = @transform_7, window_bounds = array<i64: 128, 128>}, {pipeline_mode = #tpu.pipeline_mode<synchronous>, transform_indices = @transform_8, window_bounds = array<i64: 1, 128>}, {transform_indices = @transform_9, window_bounds = array<i64: 128, 128>}]} {
    %c0_i32 = arith.constant 0 : i32
    %0 = arith.cmpi eq, %arg1, %c0_i32 : i32
    %1 = arith.extui %0 : i1 to i32
    %c0_i32_0 = arith.constant 0 : i32
    %2 = arith.cmpi ne, %1, %c0_i32_0 : i32
    scf.if %2 {
      %cst_34 = arith.constant 0.000000e+00 : f32
      %65 = vector.broadcast %cst_34 : f32 to vector<128x128xf32>
      %c0_35 = arith.constant 0 : index
      %c0_36 = arith.constant 0 : index
      %66 = vector.load %arg11[%c0_35, %c0_36] : memref<128x128xf32, #tpu.memory_space<vmem>>, vector<128x128xf32>
      tpu.vector_store %arg11[%c0_35, %c0_36], %65 {strides = array<i32>} : memref<128x128xf32, #tpu.memory_space<vmem>>, vector<128x128xf32>,
    } else {
    }
    %c0 = arith.constant 0 : index
    %c0_1 = arith.constant 0 : index
    %3 = vector.load %arg5[%c0, %c0_1] : memref<8x128xf32, #tpu.memory_space<vmem>>, vector<8x128xf32>
    %c0_2 = arith.constant 0 : index
    %c0_3 = arith.constant 0 : index
    %4 = vector.load %arg7[%c0_2, %c0_3] : memref<128x128xf32, #tpu.memory_space<vmem>>, vector<128x128xf32>
    %cst = arith.constant dense<0.000000e+00> : vector<8x128xf32>
    %5 = tpu.matmul %3, %4, %cst {dimension_numbers = #tpu.dot_dimension_numbers<[1], [0], [0], [1], [0, 0, 1, 1], [], []>} : vector<8x128xf32>, vector<128x128xf32>, vector<8x128xf32> -> vector<8x128xf32>
    %c0_4 = arith.constant 0 : index
    %c0_5 = arith.constant 0 : index
    %6 = vector.load %arg8[%c0_4, %c0_5] : memref<1x128xf32, #tpu.memory_space<vmem>>, vector<1x128xf32>
    %7 = vector.broadcast %6 : vector<1x128xf32> to vector<8x128xf32>
    %8 = arith.addf %5, %7 : vector<8x128xf32>
    %cst_6 = arith.constant 0.000000e+00 : f32
    %9 = vector.broadcast %cst_6 : f32 to vector<8x128xf32>
    %10 = arith.maximumf %8, %9 : vector<8x128xf32>
    %11 = vector.broadcast %cst_6 : f32 to vector<8x128xf32>
    %12 = arith.subf %8, %11 : vector<8x128xf32>
    %13 = arith.cmpf one, %12, %12 : vector<8x128xf32>
    %14 = vector.broadcast %cst_6 : f32 to vector<8x128xf32>
    %15 = arith.addf %8, %14 : vector<8x128xf32>
    %16 = math.absf %12 : vector<8x128xf32>
    %cst_7 = arith.constant 0.000000e+00 : f32
    %17 = vector.broadcast %cst_7 : f32 to vector<8x128xf32>
    %18 = arith.subf %17, %16 : vector<8x128xf32>
    %19 = math.exp %18 : vector<8x128xf32>
    %20 = math.log1p %19 : vector<8x128xf32>
    %21 = arith.addf %10, %20 : vector<8x128xf32>
    %22 = arith.select %13, %15, %21 : vector<8x128xi1>, vector<8x128xf32>
    %cst_8 = arith.constant 0.693147182 : f32
    %23 = vector.broadcast %cst_8 : f32 to vector<8x128xf32>
    %24 = arith.subf %22, %23 : vector<8x128xf32>
    %c0_9 = arith.constant 0 : index
    %c0_10 = arith.constant 0 : index
    %25 = vector.load %arg9[%c0_9, %c0_10] : memref<128x128xf32, #tpu.memory_space<vmem>>, vector<128x128xf32>
    %cst_11 = arith.constant dense<0.000000e+00> : vector<8x128xf32>
    %26 = tpu.matmul %24, %25, %cst_11 {dimension_numbers = #tpu.dot_dimension_numbers<[1], [0], [0], [1], [0, 0, 1, 1], [], []>} : vector<8x128xf32>, vector<128x128xf32>, vector<8x128xf32> -> vector<8x128xf32>
    %c0_12 = arith.constant 0 : index
    %c0_13 = arith.constant 0 : index
    %27 = vector.load %arg10[%c0_12, %c0_13] : memref<1x128xf32, #tpu.memory_space<vmem>>, vector<1x128xf32>
    %28 = vector.broadcast %27 : vector<1x128xf32> to vector<8x128xf32>
    %29 = arith.addf %26, %28 : vector<8x128xf32>
    %c0_14 = arith.constant 0 : index
    %c0_15 = arith.constant 0 : index
    %30 = vector.load %arg4[%c0_14, %c0_15] : memref<8x1xf32, #tpu.memory_space<vmem>>, vector<8x1xf32>
    %cst_16 = arith.constant 0.314159274 : f32
    %31 = vector.broadcast %cst_16 : f32 to vector<8x1xf32>
    %32 = arith.mulf %30, %31 : vector<8x1xf32>
    %33 = math.cos %32 : vector<8x1xf32>
    %cst_17 = arith.constant 1.000000e+00 : f32
    %34 = vector.broadcast %cst_17 : f32 to vector<8x1xf32>
    %35 = arith.addf %33, %34 : vector<8x1xf32>
    %cst_18 = arith.constant 5.000000e-01 : f32
    %36 = vector.broadcast %cst_18 : f32 to vector<8x1xf32>
    %37 = arith.mulf %36, %35 : vector<8x1xf32>
    %cst_19 = arith.constant 1.000000e+01 : f32
    %38 = vector.broadcast %cst_19 : f32 to vector<8x1xf32>
    %39 = arith.cmpf ole, %30, %38 : vector<8x1xf32>
    %cst_20 = arith.constant 0.000000e+00 : f32
    %40 = vector.broadcast %cst_20 : f32 to vector<8x1xf32>
    %41 = arith.cmpf oge, %30, %40 : vector<8x1xf32>
    %42 = arith.andi %39, %41 : vector<8x1xi1>
    %cst_21 = arith.constant 0.000000e+00 : f32
    %43 = vector.broadcast %cst_21 : f32 to vector<8x1xf32>
    %44 = arith.select %42, %37, %43 : vector<8x1xi1>, vector<8x1xf32>
    %45 = vector.broadcast %44 : vector<8x1xf32> to vector<8x128xf32>
    %46 = arith.mulf %29, %45 : vector<8x128xf32>
    %47 = tpu.iota {dimensions = array<i32: 1>} : vector<8x128xi32>
    %c0_22 = arith.constant 0 : index
    %c0_23 = arith.constant 0 : index
    %48 = vector.load %arg2[%c0_22, %c0_23] : memref<8x1xi32, #tpu.memory_space<vmem>>, vector<8x1xi32>
    %49 = vector.broadcast %48 : vector<8x1xi32> to vector<8x128xi32>
    %50 = arith.cmpi eq, %47, %49 : vector<8x128xi32>
    %51 = arith.extui %50 : vector<8x128xi1> to vector<8x128xi32>
    %52 = arith.sitofp %51 : vector<8x128xi32> to vector<8x128xf32>
    %c0_24 = arith.constant 0 : index
    %c0_25 = arith.constant 0 : index
    %53 = vector.load %arg6[%c0_24, %c0_25] : memref<128x128xf32, #tpu.memory_space<vmem>>, vector<128x128xf32>
    %cst_26 = arith.constant dense<0.000000e+00> : vector<8x128xf32>
    %54 = tpu.matmul %52, %53, %cst_26 {dimension_numbers = #tpu.dot_dimension_numbers<[1], [0], [0], [1], [0, 0, 1, 1], [], []>} : vector<8x128xf32>, vector<128x128xf32>, vector<8x128xf32> -> vector<8x128xf32>
    %55 = arith.mulf %54, %46 : vector<8x128xf32>
    %c0_27 = arith.constant 0 : index
    %c0_28 = arith.constant 0 : index
    %56 = vector.load %arg3[%c0_27, %c0_28] : memref<8x1xi32, #tpu.memory_space<vmem>>, vector<8x1xi32>
    %57 = vector.broadcast %56 : vector<8x1xi32> to vector<8x128xi32>
    %58 = arith.cmpi eq, %47, %57 : vector<8x128xi32>
    %59 = arith.extui %58 : vector<8x128xi1> to vector<8x128xi32>
    %60 = arith.sitofp %59 : vector<8x128xi32> to vector<8x128xf32>
    %c0_29 = arith.constant 0 : index
    %c0_30 = arith.constant 0 : index
    %61 = vector.load %arg11[%c0_29, %c0_30] : memref<128x128xf32, #tpu.memory_space<vmem>>, vector<128x128xf32>
    %cst_31 = arith.constant dense<0.000000e+00> : vector<128x128xf32>
    %62 = tpu.matmul %60, %55, %cst_31 {dimension_numbers = #tpu.dot_dimension_numbers<[0], [0], [1], [1], [0, 1, 1, 1], [], []>} : vector<8x128xf32>, vector<8x128xf32>, vector<128x128xf32> -> vector<128x128xf32>
    %63 = arith.addf %61, %62 : vector<128x128xf32>
    %c0_32 = arith.constant 0 : index
    %c0_33 = arith.constant 0 : index
    %64 = vector.load %arg11[%c0_32, %c0_33] : memref<128x128xf32, #tpu.memory_space<vmem>>, vector<128x128xf32>
    tpu.vector_store %arg11[%c0_32, %c0_33], %63 {strides = array<i32>} : memref<128x128xf32, #tpu.memory_space<vmem>>, vector<128x128xf32>,
    return
  }
  func.func @transform_0(%arg0: i32, %arg1: i32) -> (i32, i32) {
    %c1_i32 = arith.constant 1 : i32
    %0 = arith.muli %arg0, %c1_i32 : i32
    %1 = arith.addi %0, %arg1 : i32
    %c0_i32 = arith.constant 0 : i32
    %c0_i32_0 = arith.constant 0 : i32
    return %1, %c0_i32 : i32, i32
  }
  func.func @transform_1(%arg0: i32, %arg1: i32) -> (i32, i32) {
    %c1_i32 = arith.constant 1 : i32
    %0 = arith.muli %arg0, %c1_i32 : i32
    %1 = arith.addi %0, %arg1 : i32
    %c0_i32 = arith.constant 0 : i32
    %c0_i32_0 = arith.constant 0 : i32
    return %1, %c0_i32 : i32, i32
  }
  func.func @transform_2(%arg0: i32, %arg1: i32) -> (i32, i32) {
    %c1_i32 = arith.constant 1 : i32
    %0 = arith.muli %arg0, %c1_i32 : i32
    %1 = arith.addi %0, %arg1 : i32
    %c0_i32 = arith.constant 0 : i32
    %c0_i32_0 = arith.constant 0 : i32
    return %1, %c0_i32 : i32, i32
  }
  func.func @transform_3(%arg0: i32, %arg1: i32) -> (i32, i32) {
    %c1_i32 = arith.constant 1 : i32
    %0 = arith.muli %arg0, %c1_i32 : i32
    %1 = arith.addi %0, %arg1 : i32
    %c0_i32 = arith.constant 0 : i32
    %c0_i32_0 = arith.constant 0 : i32
    return %1, %c0_i32 : i32, i32
  }
  func.func @transform_4(%arg0: i32, %arg1: i32) -> (i32, i32) {
    %c0_i32 = arith.constant 0 : i32
    %c0_i32_0 = arith.constant 0 : i32
    %c0_i32_1 = arith.constant 0 : i32
    return %c0_i32, %c0_i32_0 : i32, i32
  }
  func.func @transform_5(%arg0: i32, %arg1: i32) -> (i32, i32) {
    %c0_i32 = arith.constant 0 : i32
    %c0_i32_0 = arith.constant 0 : i32
    %c0_i32_1 = arith.constant 0 : i32
    return %c0_i32, %c0_i32_0 : i32, i32
  }
  func.func @transform_6(%arg0: i32, %arg1: i32) -> (i32, i32) {
    %c0_i32 = arith.constant 0 : i32
    %c0_i32_0 = arith.constant 0 : i32
    %c0_i32_1 = arith.constant 0 : i32
    return %c0_i32, %c0_i32_0 : i32, i32
  }
  func.func @transform_7(%arg0: i32, %arg1: i32) -> (i32, i32) {
    %c0_i32 = arith.constant 0 : i32
    %c0_i32_0 = arith.constant 0 : i32
    %c0_i32_1 = arith.constant 0 : i32
    return %c0_i32, %c0_i32_0 : i32, i32
  }
  func.func @transform_8(%arg0: i32, %arg1: i32) -> (i32, i32) {
    %c0_i32 = arith.constant 0 : i32
    %c0_i32_0 = arith.constant 0 : i32
    %c0_i32_1 = arith.constant 0 : i32
    return %c0_i32, %c0_i32_0 : i32, i32
  }
  func.func @transform_9(%arg0: i32, %arg1: i32) -> (i32, i32) {
    %c0_i32 = arith.constant 0 : i32
    %c0_i32_0 = arith.constant 0 : i32
    return %arg0, %c0_i32 : i32, i32
  }
}

</mosaic_0001>

<bundles_post_ra>
// kernel: tpu_custom_call.1
= control target key start
LH: loop header
LB: loop body
LE: loop exit
PB: predicated region body
PF: predicated region fallthrough
CT: control target
= control target key end

     0   :  { %s2343_s0 = inlined_call_operand.vmem [shape: s32[16,1], index: 0, kind: input, shape index: {}]   ;;  %s2344_s1 = inlined_call_operand.vmem [shape: s32[16,1], index: 1, kind: input, shape index: {}]   ;;  %s2345_s2 = inlined_call_operand.vmem [shape: f32[16,1], index: 2, kind: input, shape index: {}]   ;;  %s2346_s3 = inlined_call_operand.vmem [shape: f32[16,128], index: 3, kind: input, shape index: {}]   ;;  %s2347_s4 = inlined_call_operand.hbm [shape: f32[128,128], index: 4, kind: input, shape index: {}]   ;;  %s2348_s5 = inlined_call_operand.hbm [shape: f32[128,128], index: 5, kind: input, shape index: {}]   ;;  %s2349_s6 = inlined_call_operand.vmem [shape: f32[1,128], index: 6, kind: input, shape index: {}]   ;;  %s2350_s7 = inlined_call_operand.hbm [shape: f32[128,128], index: 7, kind: input, shape index: {}]   ;;  %s2351_s8 = inlined_call_operand.vmem [shape: f32[1,128], index: 8, kind: input, shape index: {}]   ;;  %s2352_s9 = inlined_call_operand.hbm [shape: f32[256,128], index: 9, kind: output, shape index: {}]  }
   0x1   :  { %2362 = sst [smem:[#allocation18_spill]] %s2348_s5 }
   0x2   :  { %14 = vsyncpa [#allocation3], 0 }
   0x3   :  { %15 = vsyncpa [#allocation6], 0 }
   0x4   :  { %16 = vsyncpa [#allocation4], 0 }
   0x5   :  { %18 = vsyncpa [#allocation4 + $0x1], 0  ;;  %s2010_s30 = smov 0   ;;  %s2012_s10 = smov 0  }
   0x6   :  { %s2014_s11 = smov 0   ;;  %s2016_s12 = smov 0  }
   0x7   :  { %s2018_s13 = smov 0   ;;  %s2020_s14 = smov 0  }
   0x8 LB: > { %2363 = sst [smem:[#allocation12_spill]] %s1919_s30  ;;  %s1335_s15 = sadd.s32 4294967295, %s1939_s14   ;;  %s1939_s14 = sphi %s2020_s14, %s24_s14   ;;  %s1935_s13 = sphi %s2018_s13, %s2385_s13   ;;  %s1931_s12 = sphi %s2016_s12, %s2388_s12   ;;  %s1927_s11 = sphi %s2014_s11, %s2383_s11   ;;  %s1923_s10 = sphi %s2012_s10, %s2387_s10   ;;  %s1919_s30 = sphi %s2010_s30, %s2386_s30  }
   0x9   : > { %2364 = sst [smem:[#allocation13_spill]] %s1927_s11  ;;  %s1336_s16 = sadd.s32 4294967294, %s1939_s14  }
   0xa   : > { %2365 = sst [smem:[#allocation14_spill]] %s1935_s13  ;;  %s36_s17 = sadd.s32 1, %s1935_s13 }
   0xb   : > { %s260_s18 = sadd.s32 1, %s1927_s11  ;;  %p38_p0 = scmp.ge.s32.totalorder %s36_s17, 2 }
   0xc   : > { %p270_p1 = scmp.ne.s32.totalorder %s1927_s11, %s1923_s10  ;;  %p271_p2 = scmp.eq.s32.totalorder %s1335_s15, 1 }
   0xd   : > { %p276_p3 = scmp.ne.s32.totalorder %s1923_s10, %s1919_s30  ;;  %s2390_s17 = smov (%p38_p0, %s36_s17), 0 }
   0xe   : > { %2366 = sst [smem:[#allocation15_spill]] %s2390_s17  ;;  %p2050_p4 = por %p271_p2, %p270_p1 }
   0xf   : > { %p277_p5 = scmp.eq.s32.totalorder %s1336_s16, 1  ;;  %s257_s20 = ssub.s32 %s1935_s13, %s2390_s17 }
  0x10   : > { %s2367_s19 = scalar_select %p2050_p4, 1, 0 }
  0x11   : > { %p1337_p6 = scmp.ge.s32.totalorder %s1939_s14, 1  ;;  %p258_p7 = scmp.eq.s32.totalorder %s257_s20, 0 }
  0x12   : > { %p2057_p8 = por %p277_p5, %p276_p3  ;;  %p284_p9 = scmp.lt.s32.totalorder %s1939_s14, 3 }
  0x13   : > { %s2063_s22 = scalar_select %p258_p7, %s1927_s11, %s260_s18  }
  0x14   : > { %s2368_s21 = scalar_select %p2057_p8, 1, 0 }
  0x15   : > { %2370 = sst [smem:[#allocation17_spill]] %s2063_s22  ;;  %p2065_p10 = pnand %p1337_p6, %p284_p9 }
  0x16   : > { %2369 = sst [smem:[#allocation16_spill]] %s2368_s21  ;;  %p2069_p11 = scmp.eq.s32.totalorder %s1335_s15, 0 }
  0x17   : > { %s2371_s23 = scalar_select %p2065_p10, 1, 0 }
  0x18   : > { %s2372_s24 = scalar_select %p2069_p11, 1, 0 }
  0x19   : > { %p1672_p12 = pneg %p2065_p10  ;;  %s1941_s25 = smov [#allocation5]  }
  0x1a   : > { %s309_s26 = sshll.u32 %s1941_s25, 4  ;;  %s1942_s28 = smov [#allocation2]   ;;  %s310_s26 = int_to_ptr.vmem [resolvable:$true] %s309_s26 }
  0x1b   : > { %p2077_p13 = pnand %p2069_p11, %p1672_p12  ;;  %s296_s29 = sshll.u32 %s1942_s28, 4  ;;  %s297_s29 = int_to_ptr.vmem [resolvable:$true] %s296_s29 }
  0x1c   : > { %s2374_s5 = sld [smem:[#allocation18_spill]] }
  0x1d   : > { %p2089_p1 = pneg %p2077_p13 }
  0x22   : > { %s1769_s15 = scalar_lea.hbm %s2374_s5, 2048 }
  0x23   : > { %p1770_p0 = scmp.ne.s32.totalorder %s2374_s5, %s1769_s15  ;;  %p1776_p5 = scmp.lt.u32.totalorder %s1769_s15, %s2374_s5 }
  0x25   : > { %p1772_p2 = pnand %p2089_p1, %p1770_p0 }
  0x27   : > { %p1773_p3 = pneg %p1772_p2 }
  0x29   : > { %p1778_p6 = pnand %p1776_p5, %p1773_p3 }
  0x2b   : > { %1781 = shalt.err (!%p1778_p6)
}
  0x2c   : > { %s1782_s28 = scalar_lea.vmem %s310_s26, 2048  ;;  %p1790_p8 = scmp.lt.s32.totalorder %s310_s26, %s310_s26 }
  0x2d   : > { %p1783_p7 = scmp.ne.s32.totalorder %s310_s26, %s1782_s28  ;;  %p1791_p4 = scmp.lt.s32.totalorder %s1782_s28, %s1782_s28 }
  0x2f   : > { %p1785_p9 = pnand %p1783_p7, %p2089_p1  ;;  %p1792_p11 = por %p1791_p4, %p1790_p8 }
  0x31   : > { %p1786_p12 = pneg %p1785_p9 }
  0x33   : > { %p1793_p10 = pnand %p1792_p11, %p1786_p12 }
  0x35   : > { %1796 = shalt.err (!%p1793_p10)
}
  0x36   : > { %s1943_s17 = smov 128   ;;  %s1944_s16 = smov 8  }
  0x37   : > { %1678 = dma.hbm_to_vmem [thread:$0]  (!%p2077_p13), %s2374_s5, 2048, %s310_s26, [#allocation6], %s1943_s17, %s1943_s17, %s1944_s16  }
  0x38   : > { %s1797_s20 = scalar_lea.hbm %s2347_s4, 2048 }
  0x39   : > { %p1798_p4 = scmp.ne.s32.totalorder %s2347_s4, %s1797_s20  ;;  %p1804_p11 = scmp.lt.u32.totalorder %s1797_s20, %s2347_s4 }
  0x3b   : > { %p1800_p8 = pnand %p1798_p4, %p2089_p1 }
  0x3d   : > { %p1801_p10 = pneg %p1800_p8 }
  0x3f   : > { %p1806_p0 = pnand %p1804_p11, %p1801_p10 }
  0x41   : > { %1809 = shalt.err (!%p1806_p0)
}
  0x42   : > { %s1810_s13 = scalar_lea.vmem %s297_s29, 2048  ;;  %p1818_p6 = scmp.lt.s32.totalorder %s297_s29, %s297_s29 }
  0x43   : > { %p1811_p2 = scmp.ne.s32.totalorder %s297_s29, %s1810_s13  ;;  %p1819_p7 = scmp.lt.s32.totalorder %s1810_s13, %s1810_s13 }
  0x45   : > { %p1813_p3 = pnand %p1811_p2, %p2089_p1  ;;  %p1820_p9 = por %p1819_p7, %p1818_p6 }
  0x47   : > { %p1814_p5 = pneg %p1813_p3 }
  0x49   : > { %p1821_p12 = pnand %p1820_p9, %p1814_p5 }
  0x4b   : > { %1824 = shalt.err (!%p1821_p12)
}
  0x4c   : > { %1675 = dma.hbm_to_vmem [thread:$0]  (!%p2077_p13), %s2347_s4, 2048, %s297_s29, [#allocation3], %s1943_s17, %s1943_s17, %s1944_s16  }
  0x4d   : > { %s1945_s21 = smov [#allocation7]   ;;  %s1825_s15 = scalar_lea.hbm %s2350_s7, 2048 }
  0x4e   : > { %s325_s26 = sshll.u32 %s1945_s21, 4  ;;  %p1826_p4 = scmp.ne.s32.totalorder %s2350_s7, %s1825_s15  ;;  %s326_s26 = int_to_ptr.vmem [resolvable:$true] %s325_s26 }
  0x4f   : > { %p1832_p11 = scmp.lt.u32.totalorder %s1825_s15, %s2350_s7 }
  0x50   : > { %p1828_p8 = pnand %p1826_p4, %p2089_p1 }
  0x52   : > { %p1829_p10 = pneg %p1828_p8 }
  0x54   : > { %p1834_p0 = pnand %p1832_p11, %p1829_p10 }
  0x56   : > { %1837 = shalt.err (!%p1834_p0)
}
  0x57   : > { %s1838_s29 = scalar_lea.vmem %s326_s26, 2048  ;;  %p1846_p6 = scmp.lt.s32.totalorder %s326_s26, %s326_s26 }
  0x58   : > { %p1839_p2 = scmp.ne.s32.totalorder %s326_s26, %s1838_s29  ;;  %p1847_p7 = scmp.lt.s32.totalorder %s1838_s29, %s1838_s29 }
  0x5a   : > { %p1841_p3 = pnand %p1839_p2, %p2089_p1  ;;  %p1848_p9 = por %p1847_p7, %p1846_p6 }
  0x5c   : > { %p1842_p5 = pneg %p1841_p3 }
  0x5e   : > { %p1849_p12 = pnand %p1848_p9, %p1842_p5 }
  0x60   : > { %1852 = shalt.err (!%p1849_p12)
}
  0x61   : > { %1681 = dma.hbm_to_vmem [thread:$0]  (!%p2077_p13), %s2350_s7, 2048, %s326_s26, [#allocation6], %s1943_s17, %s1943_s17, %s1944_s16  }
  0x62   : > { %p2376_p4 = scmp.ne.s32.totalorder %s2371_s23, 0 }
  0x63   : > { %p2377_p1 = scmp.ne.s32.totalorder (!%p2376_p4), %s2372_s24, 0 }
  0x64   : > { %380 = sbr.rel (%p2376_p4) target bundleno = 873 (0x369), region = 56 }
  0x6b   : > { %1906 = dma.done.wait (%p2377_p1), [#allocation3], 2048  }
  0x6c   : > { %1908 = vsyncadd (%p2377_p1), [#allocation3], 4294965248 }
  0x6d   : > { %1910 = dma.done.wait (%p2377_p1), [#allocation6], 4096  }
  0x6e   : > { %1912 = vsyncadd (%p2377_p1), [#allocation6], 4294963200  ;;  %p440_p8 = scmp.lt.s32.totalorder %s1931_s12, 1  ;;  %v1946_v0 = vmov 0.0|0.0   ;;  %vm1947_vm0 = vmmov 0   ;;  %v1948_v1 = vmov 0.0  }
  0x6f   : > { %1582 = vmatprep.subr.bf16.mxu0 %v1946_v0  ;;  %1483 = vmatprep.mubr.msk.f32.mxu0 %vm1947_vm0, %v1948_v1  ;;  %v1949_v2 = vmov 0   ;;  %v485_v3 = vld [vmem:[#allocation5] sm:$0xff]  ;;  %v486_v4 = vld [vmem:[#allocation5 + $0x8] sm:$0xff]  ;;  %v487_v5 = vld [vmem:[#allocation5 + $0x10] sm:$0xff]  ;;  %v1950_v40 = vmov 2102212464  }
  0x70   : > { %1759 = vset.pattern.permute.xlu0 %v1949_v2  ;;  %1760 = vset.pattern.permute.xlu1 %v1949_v2  ;;  %s441_s23 = scalar_select %p440_p8, %s1931_s12, 1  ;;  %v1583_v6 = vpack.c.bf16 %v486_v4, %v485_v3  ;;  %v488_v7 = vld [vmem:[#allocation5 + $0x18] sm:$0xff]  ;;  %v489_v9 = vld [vmem:[#allocation5 + $0x20] sm:$0xff]  ;;  %v490_v10 = vld [vmem:[#allocation5 + $0x28] sm:$0xff]  ;;  %v1951_v44 = vmov 683565275  }
  0x71   : > { %1606 = vmatprep.subr.bf16.mxu1 %v1946_v0  ;;  %1518 = vmatprep.mubr.msk.f32.mxu1 %vm1947_vm0, %v1948_v1  ;;  %v1586_v8 = vpack.c.bf16 %v488_v7, %v487_v5  ;;  %v1589_v12 = vpack.c.bf16 %v490_v10, %v489_v9  ;;  %v491_v14 = vld [vmem:[#allocation5 + $0x30] sm:$0xff]  ;;  %v492_v15 = vld [vmem:[#allocation5 + $0x38] sm:$0xff]  ;;  %v493_v17 = vld [vmem:[#allocation5 + $0x40] sm:$0xff]  ;;  %v1952_v46 = vmov 2475754826   ;;  %s1382_s25 = sshll.u32 %s1931_s12, 11 }
  0x72   : > { %s2168_s24 = sshll.u32 %s441_s23, 3  ;;  %1584 = vmatpush3.bf16.msra.mxu0 %v1583_v6  ;;  %v1592_v16 = vpack.c.bf16 %v492_v15, %v491_v14  ;;  %v494_v18 = vld [vmem:[#allocation5 + $0x48] sm:$0xff]  ;;  %v495_v20 = vld [vmem:[#allocation5 + $0x50] sm:$0xff]  ;;  %v496_v21 = vld [vmem:[#allocation5 + $0x58] sm:$0xff]  ;;  %v1953_v49 = vmov 2131351028  }
  0x73   : > { %s443_s17 = scalar_lea.vmem %s2343_s0, %s2168_s24  ;;  %1585 = vmatprep.subr.bf16.mxu0 %v1946_v0  ;;  %s449_s21 = scalar_lea.vmem %s2344_s1, %s2168_s24  ;;  %v1595_v19 = vpack.c.bf16 %v494_v18, %v493_v17  ;;  %v1598_v22 = vpack.c.bf16 %v496_v21, %v495_v20  ;;  %v497_v23 = vld [vmem:[#allocation5 + $0x60] sm:$0xff]  ;;  %v498_v24 = vld [vmem:[#allocation5 + $0x68] sm:$0xff]  ;;  %v499_v26 = vld [vmem:[#allocation5 + $0x70] sm:$0xff]  ;;  %v1954_v55 = vmov 920167782  }
  0x74   : > { %v809_v11 = vld [vmem:[%s443_s17] sm:$0xff]  ;;  %v1601_v25 = vpack.c.bf16 %v498_v24, %v497_v23  ;;  %v500_v27 = vld [vmem:[#allocation5 + $0x78] sm:$0xff]  ;;  %s461_s18 = scalar_lea.vmem %s2346_s3, %s2168_s24  ;;  %s455_s28 = scalar_lea.vmem %s2345_s2, %s2168_s24  ;;  %v1955_v61 = vmov 1326507024  }
  0x75   : > { %811 = vperm.xlu0 %1759, %v809_v11   ;;  %v903_v13 = vld [vmem:[%s449_s21] sm:$0xff]  ;;  %v1604_v28 = vpack.c.bf16 %v500_v27, %v499_v26  ;;  %s436_s23 = sand.u32 1, %s1923_s10   ;;  %s2289_s21 = scalar_lea.hbm %s2352_s9, %s1382_s25 }
  0x76   : > { %1587 = vmatpush3.bf16.msra.mxu0 %v1586_v8  ;;  %v484_v29 = vld [vmem:[%s461_s18] sm:$0xff]  ;;  %s1346_s24 = sshll.u32 %s436_s23, 7  ;;  %s2297_s26 = scalar_lea.sflag [#allocation4], %s436_s23 }
  0x77   : > { %1588 = vmatprep.subr.bf16.mxu0 %v1946_v0  ;;  %v2194_v30 = vld [vmem:[%s455_s28] sm:$0xff]  ;;  %s2268_s27 = scalar_lea.vmem [#allocation8], %s1346_s24  ;;  %p2378_p10 = scmp.ne.s32.totalorder %s2367_s19, 0 }
  0x78   : > { %v2197_v31 = vmul.f32 0.31415927, %v2194_v30  ;;  %vm797_vm14 = vcmp.le.f32.partialorder %v2194_v30, 10.0  ;;  %vm798_vm15 = vcmp.ge.f32.partialorder %v2194_v30, 0.0  ;;  %s1198_s17 = sshll.u32 %s2268_s27, 4  ;;  %s1957_s22 = smov [#allocation8]   ;;  %s2291_s17 = int_to_ptr.vmem [resolvable:$true] %s1198_s17 }
  0x79   : > { %905 = vperm.xlu0 %1759, %v903_v13   ;;  %s1853_s12 = scalar_lea.vmem %s2291_s17, 2048  ;;  %s1857_s18 = sshll.u32 %s1957_s22, 4  ;;  %s1858_s18 = int_to_ptr.vmem [resolvable:$false] %s1857_s18 }
  0x7a   : > { %1590 = vmatpush3.bf16.msra.mxu0 %v1589_v12  ;;  %v695_v32 = vand.u32 2139095040, %v2197_v31  ;;  %v692_v39 = vand.u32 2147483647, %v2197_v31  ;;  %vm694_vm8 = vcmp.lt.s32.totalorder %v2197_v31, 0  ;;  %vm784_vm13 = vweird.f32 %v2197_v31  ;;  %p1854_p13 = scmp.ne.s32.totalorder %s2291_s17, %s1853_s12  ;;  %s1859_s15 = scalar_lea.vmem %s1858_s18, 4096 }
  0x7b   : > { %1591 = vmatprep.subr.bf16.mxu0 %v1946_v0  ;;  %p1860_p2 = scmp.lt.s32.totalorder %s2291_s17, %s1858_s18  ;;  %p1861_p3 = scmp.lt.s32.totalorder %s1859_s15, %s1853_s12 }
  0x7c   : > { %v696_v33 = vshrl.u32 %v695_v32, 23  ;;  %v699_v42 = vand.u32 8388607, %v692_v39  ;;  %vm693_vm9 = vcmp.le.f32.partialorder %v692_v39, 0.7853982  ;;  %p1855_p11 = pnand %p1854_p13, %p2378_p10 }
  0x7d   : > { %p1862_p5 = por %p1861_p3, %p1860_p2 }
  0x7e   : > { %1593 = vmatpush3.bf16.msra.mxu0 %v1592_v16  ;;  %v1354_v34 = vadd.s32 4294967169, %v696_v33  ;;  %v700_v53 = vor.u32 8388608, %v699_v42  ;;  %p1856_p0 = pneg %p1855_p11 }
  0x7f   : > { %1594 = vmatprep.subr.bf16.mxu0 %v1946_v0 }
  0x80   : > { %v702_v35 = vadd.s32 1, %v1354_v34  ;;  %v740_v4 = vshll.u32 %v700_v53, 8  ;;  %p1863_p6 = pnand %p1862_p5, %p1856_p0 }
  0x82   : > { %1596 = vmatpush3.bf16.msra.mxu0 %v1595_v19  ;;  %vm703_vm1 = vcmp.gt.s32.totalorder %v702_v35, 0 }
  0x83   : > { %1597 = vmatprep.subr.bf16.mxu0 %v1946_v0  ;;  %v704_v36 = vsel %vm703_vm1, %v702_v35, 0 }
  0x84   : > { %v706_v37 = vand.u32 31, %v704_v36  ;;  %v705_v43 = vshrl.u32 %v704_v36, 5 }
  0x86   : > { %1599 = vmatpush3.bf16.msra.mxu0 %v1598_v22  ;;  %v707_v38 = vsub.s32 32, %v706_v37  ;;  %v718_v41 = vshll.u32 %v1950_v40, %v706_v37  ;;  %v709_v45 = vshll.u32 %v1951_v44, %v706_v37  ;;  %v712_v48 = vshll.u32 %v1952_v46, %v706_v37 }
  0x87   : > { %1600 = vmatprep.subr.bf16.mxu0 %v1946_v0  ;;  %v715_v51 = vshll.u32 %v1953_v49, %v706_v37  ;;  %v721_v57 = vshll.u32 %v1954_v55, %v706_v37  ;;  %vm724_vm2 = vcmp.lt.s32.totalorder %v705_v43, 1  ;;  %vm726_vm3 = vcmp.lt.s32.totalorder %v705_v43, 3 }
  0x88   : > { %v710_v47 = vshrl.u32 %v1952_v46, %v707_v38  ;;  %v713_v50 = vshrl.u32 %v1953_v49, %v707_v38  ;;  %v716_v52 = vshrl.u32 %v1950_v40, %v707_v38  ;;  %v719_v56 = vshrl.u32 %v1954_v55, %v707_v38 }
  0x89   : > { %v722_v62 = vshrl.u32 %v1955_v61, %v707_v38  ;;  %vm725_vm4 = vcmp.lt.s32.totalorder %v705_v43, 2  ;;  %vm727_vm5 = vcmp.lt.s32.totalorder %v705_v43, 4  ;;  %v708_v5 = vshrl.u32 %v1951_v44, %v707_v38 }
  0x8a   : > { %1602 = vmatpush3.bf16.msra.mxu0 %v1601_v25  ;;  %v711_v54 = vor.u32 %v710_v47, %v709_v45  ;;  %v714_v58 = vor.u32 %v713_v50, %v712_v48  ;;  %v717_v59 = vor.u32 %v716_v52, %v715_v51  ;;  %v720_v60 = vor.u32 %v719_v56, %v718_v41 }
  0x8b   : > { %1603 = vmatprep.subr.bf16.mxu0 %v1946_v0  ;;  %v723_v2 = vor.u32 %v722_v62, %v721_v57 }
  0x8c   : > { %v732_v63 = vsel %vm724_vm2, %v711_v54, %v714_v58  ;;  %v733_v3 = vsel %vm727_vm5, %v720_v60, 920167782  ;;  %v736_v7 = vsel %vm724_vm2, %v714_v58, %v717_v59  ;;  %v729_v8 = vsel %vm727_vm5, %v717_v59, 2102212464 }
  0x8d   : > { %v734_v6 = vsel %vm726_vm3, %v717_v59, %v733_v3  ;;  %v737_v10 = vsel %vm727_vm5, %v723_v2, 1326507024  ;;  %v728_v11 = vsel %vm724_vm2, %v708_v5, %v711_v54  ;;  %v730_v12 = vsel %vm726_vm3, %v714_v58, %v729_v8  ;;  %v597_v2 = vld [vmem:[#allocation7] sm:$0xff]  ;;  %v598_v3 = vld [vmem:[#allocation7 + $0x8] sm:$0xff]  ;;  %v599_v8 = vld [vmem:[#allocation7 + $0x10] sm:$0xff] }
  0x8e   : > { %1605 = vmatpush3.bf16.msra.mxu0 %v1604_v28  ;;  %v735_v9 = vsel %vm725_vm4, %v732_v63, %v734_v6  ;;  %v738_v13 = vsel %vm726_vm3, %v720_v60, %v737_v10  ;;  %v731_v14 = vsel %vm725_vm4, %v728_v11, %v730_v12  ;;  %v816_v6 = vld [vmem:[#allocation2] sm:$0xff]  ;;  %v818_v10 = vld [vmem:[#allocation2 + $0x10] sm:$0xff]  ;;  %v819_v11 = vld [vmem:[#allocation2 + $0x18] sm:$0xff]  ;;  %vm958_vm5 = vcmask 64512  }
  0x8f   : > { %1630 = vmatprep.subr.bf16.mxu0 %v1946_v0  ;;  %v739_v15 = vsel %vm725_vm4, %v736_v7, %v738_v13  ;;  %v2211_v16 = vmul.u32.u64.low %v740_v4, %v735_v9  ;;  %v2212_v17 = vmul.u32.u64.high %v740_v4, %v735_v9, %v2211_v16  ;;  %v747_v20 = vmul.u32 %v740_v4, %v731_v14  ;;  %v817_v7 = vld [vmem:[#allocation2 + $0x8] sm:$0xff]  ;;  %v600_v9 = vld [vmem:[#allocation7 + $0x18] sm:$0xff]  ;;  %v601_v12 = vld [vmem:[#allocation7 + $0x20] sm:$0xff] }
  0x90   : > { %v2214_v18 = vmul.u32.u64.low %v740_v4, %v739_v15  ;;  %v2215_v19 = vmul.u32.u64.high %v740_v4, %v739_v15, %v2214_v18  ;;  %v1607_v4 = vpack.c.bf16 %v598_v3, %v597_v2  ;;  %v1610_v30 = vpack.c.bf16 %v600_v9, %v599_v8  ;;  %v602_v13 = vld [vmem:[#allocation7 + $0x28] sm:$0xff]  ;;  %v820_v15 = vld [vmem:[#allocation2 + $0x20] sm:$0xff] }
  0x91   : > { %1484 = vmatmul.mubr.f32.vlgmr.msra.gmra.mrb[0].mxu0 %v484_v29  ;;  %v750_v21 = vadd.s32 1, %v2212_v17  ;;  %v1634_v14 = vpack.c.bf16 %v819_v11, %v818_v10  ;;  %v603_v18 = vld [vmem:[#allocation7 + $0x30] sm:$0xff] }
  0x92   : > { %1553 = vmatprep.mubr.msk.f32.mxu0 %vm1947_vm0, %v1948_v1  ;;  %vm749_vm6 = vc.u32 %v2215_v19, %v2211_v16  ;;  %v748_v34 = vadd.s32 %v2211_v16, %v2215_v19  ;;  %vm799_vm0 = vmand %vm797_vm14, %vm798_vm15  ;;  %1608 = vmatpush3.bf16.msra.mxu1 %v1607_v4  ;;  %v821_v16 = vld [vmem:[#allocation2 + $0x28] sm:$0xff]  ;;  %v604_v19 = vld [vmem:[#allocation7 + $0x38] sm:$0xff] }
  0x93   : > { %v751_v22 = vsel %vm749_vm6, %v750_v21, %v2212_v17  ;;  %1609 = vmatprep.subr.bf16.mxu1 %v1946_v0  ;;  %v1613_v17 = vpack.c.bf16 %v602_v13, %v601_v12  ;;  %v822_v21 = vld [vmem:[#allocation2 + $0x30] sm:$0xff] }
  0x94   : > { %v752_v23 = vadd.s32 %v751_v22, %v747_v20  ;;  %v1637_v20 = vpack.c.bf16 %v821_v16, %v820_v15  ;;  %v823_v22 = vld [vmem:[#allocation2 + $0x38] sm:$0xff] }
  0x96   : > { %v753_v24 = vadd.s32 536870912, %v752_v23  ;;  %1611 = vmatpush3.bf16.msra.mxu1 %v1610_v30 }
  0x97   : > { %1612 = vmatprep.subr.bf16.mxu1 %v1946_v0 }
  0x98   : > { %v754_v25 = vshrl.u32 %v753_v24, 30  ;;  %v605_v24 = vld [vmem:[#allocation7 + $0x40] sm:$0xff] }
  0x9a   : > { %v755_v26 = vshll.u32 %v754_v25, 30  ;;  %v778_v51 = vsub.s32 4, %v754_v25  ;;  %1614 = vmatpush3.bf16.msra.mxu1 %v1613_v17 }
  0x9b   : > { %1615 = vmatprep.subr.bf16.mxu1 %v1946_v0 }
  0x9c   : > { %v756_v27 = vsub.s32 %v752_v23, %v755_v26  ;;  %v779_v52 = vsel %vm694_vm8, %v778_v51, %v754_v25  ;;  %v1616_v23 = vpack.c.bf16 %v604_v19, %v603_v18  ;;  %v606_v25 = vld [vmem:[#allocation7 + $0x48] sm:$0xff]  ;;  %v1640_v26 = vpack.c.bf16 %v823_v22, %v822_v21 }
  0x9d   : > { %v781_v53 = vsel %vm693_vm9, 0, %v779_v52  ;;  %v830_v52 = vld [vmem:[#allocation2 + $0x70] sm:$0xff] }
  0x9e   : > { %v758_v28 = vsub.s32 0, %v756_v27  ;;  %v785_v54 = vand.u32 3, %v781_v53  ;;  %1617 = vmatpush3.bf16.msra.mxu1 %v1616_v23  ;;  %v831_v53 = vld [vmem:[#allocation2 + $0x78] sm:$0xff]  ;;  %v1353_v23 = vld [vmem:[%s2351_s8] ss:$0 sm:$0xff] }
  0x9f   : > { %1618 = vmatprep.subr.bf16.mxu1 %v1946_v0 }
  0xa0   : > { %v1355_v29 = vmin.u32 %v758_v28, %v756_v27  ;;  %vm790_vm10 = vcmp.eq.s32.totalorder %v785_v54, 2  ;;  %vm787_vm11 = vcmp.eq.s32.totalorder %v785_v54, 0  ;;  %vm786_vm12 = vcmp.lt.s32.totalorder %v785_v54, 2  ;;  %v825_v28 = vld [vmem:[#allocation2 + $0x48] sm:$0xff] }
  0xa1   : > { %v1652_v54 = vpack.c.bf16 %v831_v53, %v830_v52 }
  0xa2   : > { %v760_v32 = vclz %v1355_v29  ;;  %v1619_v29 = vpack.c.bf16 %v606_v25, %v605_v24 }
  0xa4   : > { %v1356_v33 = vadd.s32 4294967294, %v760_v32  ;;  %v607_v32 = vld [vmem:[#allocation7 + $0x50] sm:$0xff]  ;;  %1620 = vmatpush3.bf16.msra.mxu1 %v1619_v29 }
  0xa5   : > { %1621 = vmatprep.subr.bf16.mxu1 %v1946_v0 }
  0xa6   : > { %vm1357_vm7 = vcmp.lt.s32.totalorder %v1356_v33, 0 }
  0xa7   : > { %v763_v35 = vsel %vm1357_vm7, 0, %v1356_v33  ;;  %v608_v33 = vld [vmem:[#allocation7 + $0x58] sm:$0xff] }
  0xa8   : > { %v764_v36 = vsub.s32 32, %v763_v35  ;;  %v765_v37 = vshll.u32 %v756_v27, %v763_v35  ;;  %v768_v38 = vsub.s32 4294967266, %v763_v35  ;;  %v824_v27 = vld [vmem:[#allocation2 + $0x40] sm:$0xff]  ;;  %v826_v35 = vld [vmem:[#allocation2 + $0x50] sm:$0xff] }
  0xaa   : > { %v766_v40 = vshrl.u32 %v748_v34, %v764_v36  ;;  %v769_v41 = vadd.s32 127, %v768_v38  ;;  %v1643_v34 = vpack.c.bf16 %v825_v28, %v824_v27  ;;  %v827_v36 = vld [vmem:[#allocation2 + $0x58] sm:$0xff]  ;;  %v609_v38 = vld [vmem:[#allocation7 + $0x60] sm:$0xff] }
  0xac   : > { %v767_v42 = vor.u32 %v766_v40, %v765_v37  ;;  %v770_v43 = vshll.u32 %v769_v41, 23  ;;  %v1622_v37 = vpack.c.bf16 %v608_v33, %v607_v32  ;;  %v610_v40 = vld [vmem:[#allocation7 + $0x68] sm:$0xff]  ;;  %v1646_v41 = vpack.c.bf16 %v827_v36, %v826_v35 }
  0xae   : > { %v771_v44 = vor.u32 4788187, %v770_v43  ;;  %v774_v45 = vcvt.s32.f32 %v767_v42  ;;  %v828_v42 = vld [vmem:[#allocation2 + $0x60] sm:$0xff]  ;;  %v829_v43 = vld [vmem:[#allocation2 + $0x68] sm:$0xff]  ;;  %1623 = vmatpush3.bf16.msra.mxu1 %v1622_v37 }
  0xaf   : > { %1624 = vmatprep.subr.bf16.mxu1 %v1946_v0 }
  0xb0   : > { %v772_v46 = vand.u32 2147483647, %v771_v44  ;;  %v1625_v44 = vpack.c.bf16 %v610_v40, %v609_v38 }
  0xb2   : > { %v775_v47 = vmul.f32 %v774_v45, %v772_v46  ;;  %v611_v45 = vld [vmem:[#allocation7 + $0x70] sm:$0xff]  ;;  %v612_v46 = vld [vmem:[#allocation7 + $0x78] sm:$0xff]  ;;  %1626 = vmatpush3.bf16.msra.mxu1 %v1625_v44 }
  0xb3   : > { %1627 = vmatprep.subr.bf16.mxu1 %v1946_v0 }
  0xb4   : > { %v776_v48 = vxor.u32 2147483648, %v775_v47 }
  0xb6   : > { %v777_v49 = vsel %vm694_vm8, %v776_v48, %v775_v47  ;;  %v1649_v47 = vpack.c.bf16 %v829_v43, %v828_v42  ;;  %v807_v48 = vlaneseq }
  0xb7   : > { %v780_v50 = vsel %vm693_vm9, %v2197_v31, %v777_v49  ;;  %v1631_v31 = vpack.c.bf16 %v817_v7, %v816_v6  ;;  %v1628_v49 = vpack.c.bf16 %v612_v46, %v611_v45 }
  0xb8   : > { %1761 = vcosq.f32 %v780_v50  ;;  %v808_v51 = vand.u32 127, %v807_v48 }
  0xb9   : > { %1763 = vsinq.f32 %v780_v50  ;;  %1632 = vmatpush3.bf16.msra.mxu0 %v1631_v31  ;;  %1629 = vmatpush3.bf16.msra.mxu1 %v1628_v49 }
  0xba   : > { %1633 = vmatprep.subr.bf16.mxu0 %v1946_v0 }
  0xbd   : > { %1635 = vmatpush3.bf16.msra.mxu0 %v1634_v14 }
  0xbe   : > { %1636 = vmatprep.subr.bf16.mxu0 %v1946_v0 }
  0xc1   : > { %1638 = vmatpush3.bf16.msra.mxu0 %v1637_v20 }
  0xc2   : > { %v1762_v55 = vpop.eup %1761  ;;  %1639 = vmatprep.subr.bf16.mxu0 %v1946_v0 }
  0xc3   : > { %v1764_v56 = vpop.eup %1763  ;;  %v791_v57 = vxor.u32 2147483648, %v1762_v55 }
  0xc4   : > { %v788_v58 = vxor.u32 2147483648, %v1764_v56 }
  0xc5   : > { %v792_v39 = vsel %vm790_vm10, %v791_v57, %v1764_v56  ;;  %1641 = vmatpush3.bf16.msra.mxu0 %v1640_v26  ;;  %v1956_v56 = vmov 1.0  }
  0xc6   : > { %v789_v59 = vsel %vm787_vm11, %v1762_v55, %v788_v58  ;;  %1642 = vmatprep.subr.bf16.mxu0 %v1946_v0  ;;  %v1351_v58 = vld [vmem:[%s2349_s6] ss:$0 sm:$0xff] }
  0xc7   : > { %v793_v60 = vsel %vm786_vm12, %v789_v59, %v792_v39 }
  0xc8   : > { %v794_v61 = vsel %vm784_vm13, nan, %v793_v60 }
  0xc9   : > { %v795_v62 = vadd.f32 1.0, %v794_v61  ;;  %1644 = vmatpush3.bf16.msra.mxu0 %v1643_v34 }
  0xca   : > { %1645 = vmatprep.subr.bf16.mxu0 %v1946_v0 }
  0xcb   : > { %v796_v63 = vmul.f32 0.5, %v795_v62 }
  0xcd   : > { %v800_v5 = vsel %vm799_vm0, %v796_v63, 0.0  ;;  %1647 = vmatpush3.bf16.msra.mxu0 %v1646_v41 }
  0xce   : > { %803 = vperm.xlu1 %1760, %v800_v5   ;;  %1648 = vmatprep.subr.bf16.mxu0 %v1946_v0 }
  0xd1   : > { %1650 = vmatpush3.bf16.msra.mxu0 %v1649_v47 }
  0xd2   : > { %1651 = vmatprep.subr.bf16.mxu0 %v1946_v0 }
  0xd5   : > { %1653 = vmatpush3.bf16.msra.mxu0 %v1652_v54 }
  0xf4   : > { %v812_v50 = vpop.permute.xlu0 %811 }
  0xf5   : > { %vm813_vm1 = vcmp.eq.s32.totalorder %v808_v51, %v812_v50 }
  0xf6   : > { %1554 = vmatmul.mubr.msk.f32.vlgmr.msra.gmra.mrb[2].mxu0 %vm813_vm1, %v1956_v56 }
  0xf8   : > { %v906_v55 = vpop.permute.xlu0 %905 }
  0xf9   : > { %vm907_vm2 = vcmp.eq.s32.totalorder %v808_v51, %v906_v55 }
  0xfa   : > { %v1360_v57 = vsel %vm907_vm2, 1.0, %v1948_v1 }
  0xfb   : > { %926 = vxpose.xlu1.b32.start.end [1/1] (short) %v1360_v57, 128 }
 0x14d   : > { %v804_v30 = vpop.permute.xlu1 %803 }
 0x164   : > { %v574_v39 = vpop.f32.mrb[0].mxu0 }
 0x165   : > { %v575_v59 = vadd.f32 %v1351_v58, %v574_v39  ;;  %v1485_v0 = vpop.f32.mrb[1].mxu0 }
 0x167   : > { %v581_v60 = vand.u32 2147483647, %v575_v59  ;;  %v578_v8 = vmax.f32 %v575_v59, 0.0  ;;  %vm579_vm4 = vcmp.ne.f32.partialorder %v575_v59, %v575_v59 }
 0x169   : > { %v582_v61 = vsub.f32 0.0, %v581_v60 }
 0x16b   : > { %v583_v62 = vmul.f32 1.442695, %v582_v61 }
 0x16d   : > { %1765 = vpow2.f32 %v583_v62 }
 0x177   : > { %v1766_v63 = vpop.eup %1765 }
 0x178   : > { %v585_v2 = vadd.f32 1.0, %v1766_v63  ;;  %v588_v3 = vmul.f32 -0.5, %v1766_v63  ;;  %v591_v5 = vand.u32 2147483647, %v1766_v63 }
 0x17a   : > { %1767 = vlog2.f32 %v585_v2  ;;  %v589_v4 = vadd.f32 1.0, %v588_v3  ;;  %vm592_vm3 = vcmp.lt.f32.partialorder %v591_v5, 0.0004427343 }
 0x17b   : > { %v942_v12 = vpop.trf.xlu1 }
 0x17c   : > { %v590_v7 = vmul.f32 %v1766_v63, %v589_v4 }
 0x17f   : > { %v943_v15 = vpop.trf.xlu1 }
 0x183   : > { %v944_v16 = vpop.trf.xlu1 }
 0x184   : > { %v1768_v6 = vpop.eup %1767 }
 0x185   : > { %v587_v1 = vmul.f32 0.6931472, %v1768_v6 }
 0x187   : > { %v593_v31 = vsel %vm592_vm3, %v590_v7, %v587_v1  ;;  %v945_v17 = vpop.trf.xlu1 }
 0x188   : > { %v594_v9 = vadd.f32 %v593_v31, %v578_v8 }
 0x18a   : > { %v595_v10 = vsel %vm579_vm4, %v575_v59, %v594_v9 }
 0x18b   : > { %v1352_v11 = vadd.f32 -0.6931472, %v595_v10  ;;  %v946_v18 = vpop.trf.xlu1 }
 0x18d   : > { %1519 = vmatmul.mubr.f32.vlgmr.msra.gmra.mrb[0].mxu1 %v1352_v11 }
 0x18e   : > { %1558 = vmatprep.mubr.msk.f32.mxu1 %vm958_vm5, %v942_v12 }
 0x18f   : > { %v947_v19 = vpop.trf.xlu1 }
 0x193   : > { %v948_v20 = vpop.trf.xlu1 }
 0x197   : > { %v949_v21 = vpop.trf.xlu1 }
 0x19b   : > { %v950_v22 = vpop.trf.xlu1 }
 0x19f   : > { %v951_v24 = vpop.trf.xlu1 }
 0x1a3   : > { %v952_v29 = vpop.trf.xlu1 }
 0x1a7   : > { %v953_v33 = vpop.trf.xlu1 }
 0x1ab   : > { %v954_v34 = vpop.trf.xlu1 }
 0x1af   : > { %v955_v35 = vpop.trf.xlu1 }
 0x1b3   : > { %v956_v36 = vpop.trf.xlu1 }
 0x1b7   : > { %v957_v37 = vpop.trf.xlu1 }
 0x1c9   : > { %v898_v13 = vpop.f32.mrb[2].mxu0 }
 0x1ca   : > { %v1555_v14 = vpop.f32.mrb[3].mxu0 }
 0x260   : > { %v686_v25 = vpop.f32.mrb[0].mxu1 }
 0x261   : > { %v687_v26 = vadd.f32 %v1353_v23, %v686_v25  ;;  %v1520_v27 = vpop.f32.mrb[1].mxu1 }
 0x263   : > { %v806_v28 = vmul.f32 %v804_v30, %v687_v26 }
 0x265   : > { %v902_v32 = vmul.f32 %v898_v13, %v806_v28 }
 0x267   : > { %1556 = vmatprep.subr.mxu1 %v902_v32 }
 0x268   : > { %1557 = vmatpush3.msra.mxu1 %v902_v32 }
 0x269   : > { %1559 = vmatmul.mubr.msk.f32.vlgmr.msra.gmra.mrb[2].mxu1 %vm958_vm5, %v943_v15 }
 0x26a   : > { %1561 = vmatprep.mubr.msk.f32.mxu1 %vm958_vm5, %v944_v16 }
 0x26d   : > { %1562 = vmatmul.mubr.msk.f32.gmra.mrb[4].mxu1 %vm958_vm5, %v945_v17 }
 0x26e   : > { %1564 = vmatprep.mubr.msk.f32.mxu1 %vm958_vm5, %v946_v18 }
 0x271   : > { %1565 = vmatmul.mubr.msk.f32.gmra.mrb[6].mxu1 %vm958_vm5, %v947_v19 }
 0x272   : > { %1567 = vmatprep.mubr.msk.f32.mxu1 %vm958_vm5, %v948_v20 }
 0x275   : > { %1568 = vmatmul.mubr.msk.f32.gmra.mrb[8].mxu1 %vm958_vm5, %v949_v21 }
 0x276   : > { %1570 = vmatprep.mubr.msk.f32.mxu1 %vm958_vm5, %v950_v22 }
 0x279   : > { %1571 = vmatmul.mubr.msk.f32.gmra.mrb[10].mxu1 %vm958_vm5, %v951_v24 }
 0x27a   : > { %1573 = vmatprep.mubr.msk.f32.mxu1 %vm958_vm5, %v952_v29 }
 0x27d   : > { %1574 = vmatmul.mubr.msk.f32.gmra.mrb[12].mxu1 %vm958_vm5, %v953_v33 }
 0x27e   : > { %1576 = vmatprep.mubr.msk.f32.mxu1 %vm958_vm5, %v954_v34 }
 0x281   : > { %1577 = vmatmul.mubr.msk.f32.gmra.mrb[14].mxu1 %vm958_vm5, %v955_v35 }
 0x282   : > { %1579 = vmatprep.mubr.msk.f32.mxu1 %vm958_vm5, %v956_v36 }
 0x285   : > { %1580 = vmatmul.mubr.msk.f32.gmra.mrb[16].mxu1 %vm958_vm5, %v957_v37 }
 0x33c   : > { %v1560_v38 = vpop.f32.mrb[2].mxu1 }
 0x33d   : > { %v1073_v40 = vpop.f32.mrb[3].mxu1  ;;  %1169 = vst [vmem:[%s2268_s27 + $0x8] sm:$0xff] %v1560_v38 }
 0x33e   : > { %1168 = vst [vmem:[%s2268_s27] sm:$0xff] %v1073_v40 }
 0x340   : > { %v1563_v41 = vpop.f32.mrb[4].mxu1 }
 0x341   : > { %v1083_v42 = vpop.f32.mrb[5].mxu1  ;;  %1171 = vst [vmem:[%s2268_s27 + $0x18] sm:$0xff] %v1563_v41 }
 0x342   : > { %1170 = vst [vmem:[%s2268_s27 + $0x10] sm:$0xff] %v1083_v42 }
 0x344   : > { %v1566_v43 = vpop.f32.mrb[6].mxu1 }
 0x345   : > { %v1093_v44 = vpop.f32.mrb[7].mxu1  ;;  %1173 = vst [vmem:[%s2268_s27 + $0x28] sm:$0xff] %v1566_v43 }
 0x346   : > { %1172 = vst [vmem:[%s2268_s27 + $0x20] sm:$0xff] %v1093_v44 }
 0x348   : > { %v1569_v45 = vpop.f32.mrb[8].mxu1 }
 0x349   : > { %v1103_v46 = vpop.f32.mrb[9].mxu1  ;;  %1175 = vst [vmem:[%s2268_s27 + $0x38] sm:$0xff] %v1569_v45 }
 0x34a   : > { %1174 = vst [vmem:[%s2268_s27 + $0x30] sm:$0xff] %v1103_v46 }
 0x34c   : > { %v1572_v47 = vpop.f32.mrb[10].mxu1 }
 0x34d   : > { %v1113_v48 = vpop.f32.mrb[11].mxu1  ;;  %1177 = vst [vmem:[%s2268_s27 + $0x48] sm:$0xff] %v1572_v47 }
 0x34e   : > { %1176 = vst [vmem:[%s2268_s27 + $0x40] sm:$0xff] %v1113_v48 }
 0x350   : > { %v1575_v49 = vpop.f32.mrb[12].mxu1 }
 0x351   : > { %v1123_v50 = vpop.f32.mrb[13].mxu1  ;;  %1179 = vst [vmem:[%s2268_s27 + $0x58] sm:$0xff] %v1575_v49 }
 0x352   : > { %1178 = vst [vmem:[%s2268_s27 + $0x50] sm:$0xff] %v1123_v50 }
 0x354   : > { %v1578_v51 = vpop.f32.mrb[14].mxu1 }
 0x355   : > { %v1133_v52 = vpop.f32.mrb[15].mxu1  ;;  %1181 = vst [vmem:[%s2268_s27 + $0x68] sm:$0xff] %v1578_v51 }
 0x356   : > { %1180 = vst [vmem:[%s2268_s27 + $0x60] sm:$0xff] %v1133_v52 }
 0x358   : > { %v1581_v53 = vpop.f32.mrb[16].mxu1 }
 0x359   : > { %v1143_v54 = vpop.f32.mrb[17].mxu1  ;;  %1183 = vst [vmem:[%s2268_s27 + $0x78] sm:$0xff] %v1581_v53 }
 0x35a   : > { %1182 = vst [vmem:[%s2268_s27 + $0x70] sm:$0xff] %v1143_v54 }
 0x35b   : > { %1866 = shalt.err (!%p1863_p6)
}
 0x35c   : > { %s1867_s20 = scalar_lea.hbm %s2289_s21, 2048  ;;  %s1871_s29 = scalar_lea.hbm %s2352_s9, 4096 }
 0x35d   : > { %p1868_p7 = scmp.ne.s32.totalorder %s2289_s21, %s1867_s20  ;;  %p1872_p4 = scmp.lt.u32.totalorder %s2289_s21, %s2352_s9 }
 0x35e   : > { %p1873_p1 = scmp.lt.u32.totalorder %s1871_s29, %s1867_s20  ;;  %p1875_p13 = scmp.lt.u32.totalorder %s1867_s20, %s2289_s21 }
 0x35f   : > { %p1869_p9 = pnand %p1868_p7, %p2378_p10 }
 0x360   : > { %p1874_p8 = por %p1873_p1, %p1872_p4 }
 0x361   : > { %p1870_p12 = pneg %p1869_p9 }
 0x362   : > { %p1876_p11 = por %p1875_p13, %p1874_p8 }
 0x364   : > { %p1877_p0 = pnand %p1876_p11, %p1870_p12 }
 0x366   : > { %1880 = shalt.err (!%p1877_p0)
}
 0x367   : > { %s1958_s23 = smov 128   ;;  %s1959_s24 = smov 8  }
 0x368   : > { %1670 = dma.vmem_to_hbm [thread:$0]  (%p2378_p10), %s2291_s17, 2048, %s2289_s21, %s2297_s26, %s1958_s23, %s1958_s23, %s1959_s24  }
 0x369 PF: > { %s2379_s27 = sld [smem:[#allocation12_spill]]  ;;  %s2380_s25 = sld [smem:[#allocation16_spill]] }
 0x36a   : > { %p1692_p2 = scmp.ge.s32.totalorder %s1939_s14, 2 }
 0x36f   : > { %s1213_s16 = sand.u32 1, %s2379_s27   ;;  %p2381_p3 = scmp.ne.s32.totalorder %s2380_s25, 0 }
 0x370   : > { %s1214_s11 = scalar_lea.sflag [#allocation4], %s1213_s16 }
 0x371   : > { %p1683_p5 = pnand %p1692_p2, %p2381_p3 }
 0x373   : > { %1914 = dma.done.wait (!%p1683_p5), %s1214_s11, 2048  }
 0x374   : > { %1916 = vsyncadd (!%p1683_p5), %s1214_s11, 4294965248  ;;  %s24_s14 = sadd.s32 1, %s1939_s14   ;;  %s2382_s12 = sld [smem:[#allocation13_spill]] }
 0x375   : > { %p21_p6 = scmp.ge.s32.totalorder %s24_s14, 4   ;;  %s2383_s11 = sld [smem:[#allocation17_spill]] }
 0x376   : > { %s2384_s22 = sld [smem:[#allocation14_spill]]  ;;  %s2385_s13 = sld [smem:[#allocation15_spill]] }
 0x377   : > { %s2386_s30 = smov %s1923_s10  ;;  %23 = sbr.rel (!%p21_p6) target bundleno = 8 (0x8), region = 117 }
 0x37a   : > { %s2387_s10 = smov %s2382_s12 }
 0x37c   : > { %s2388_s12 = smov %s2384_s22 }
 0x37e   :  { %1219 = vsyncpa [#allocation3], 1 }
 0x37f   :  { %1221 = vsyncpa [#allocation3 + $0x1], 1 }
 0x380   :  { %1222 = vsyncpa [#allocation6], 1 }
 0x381   :  { %1223 = vsyncpa [#allocation4], 1 }
 0x382   :  { %1225 = vsyncpa [#allocation4 + $0x1], 1 }

</bundles_post_ra>
